<compile_context>
chip_gen: v7x
topology: tpu7x:2x2x1
jax: 0.10.0
libtpu: 0.0.40
codegen_flags: <defaults>
</compile_context>

<pallas_src>
import jax
import jax.numpy as jnp
from jax.experimental import pallas as pl
from jax.experimental.pallas import tpu as pltpu


def _proj_kernel(x_ref, w_ref, pos_ref, out_ref):
    # x_ref:   (1, TILE_N, Din) bf16 — one batch element's n-tile of patches
    # w_ref:   (Din, L)         bf16 — W^T; constant block index => DMA'd once
    # pos_ref: (TILE_N, L)      f32  — pos rows w/ linear bias folded in;
    #                                  block index depends only on n => DMA'd
    #                                  once per n-tile, not once per batch.
    # out_ref: (1, TILE_N, L)
    acc = jnp.dot(x_ref[0], w_ref[...], preferred_element_type=jnp.float32)
    out_ref[0] = (acc + pos_ref[...]).astype(out_ref.dtype)


def input_embedding(x_nchw, w_t, bias, class_token, pos_embedding, patch_size,
                    tile_n=512):
    """ViT input embedding.

    x_nchw:        (B, C, H, W)
    w_t:           (Din, L)     transposed nn.Linear weight, Din = p*p*C
    bias:          (L,)
    class_token:   (B, 1, L)
    pos_embedding: (1, N+1, L)
    returns        (B, N+1, L)  == cat([cls, patches @ W^T + bias], 1) + pos
    """
    B, C, H, W = x_nchw.shape
    p = patch_size
    hp, wp = H // p, W // p
    N = hp * wp
    Din = p * p * C
    L = w_t.shape[1]
    out_dtype = x_nchw.dtype

    # bf16 BEFORE the patchify rearrange: the reshape/transpose is a full HBM
    # round trip of the activations, so do it on half-width elements.
    # TODO(synk): fuse the rearrange into the kernel (BlockSpec over raw NCHW
    # h-strips) and/or set allow_input_fusion to remove this pass entirely.
    x_bf16 = x_nchw.astype(jnp.bfloat16)
    patches = x_bf16.reshape(B, C, hp, p, wp, p)
    patches = patches.transpose(0, 2, 4, 3, 5, 1)          # (B, hp, wp, p, p, C)
    patches = patches.reshape(B, N, Din)                   # (B, N, Din) bf16

    w_bf16 = w_t.astype(jnp.bfloat16)

    # Fold the linear bias into the patch-row positional embedding (f32).
    # Kept at (N, L): NOT tiled over batch — deduplicated via the 2-D grid.
    pos = pos_embedding.reshape(N + 1, L).astype(jnp.float32)
    pos_rows = pos[1:] + bias.astype(jnp.float32)          # (N, L)

    # Tile over the patch/sequence axis; batch is the innermost grid axis so
    # the pos / W^T block indices don't change between consecutive steps and
    # their re-DMA is skipped.  No padding: the ragged final n-tile (when
    # tile_n does not divide N) is masked by the pipeline (pure map => safe).
    tile_n = min(tile_n, N)
    if tile_n < N:
        tile_n = max(8, (tile_n // 8) * 8)                 # (8,128) sublane rule
    grid = (pl.cdiv(N, tile_n), B)

    # Explicit VMEM budget: per-block need (double-buffered) with headroom,
    # clamped to [32 MiB, 64 MiB] — above v5e's 16 MiB scoped default, at or
    # below every generation's physical VMEM (v7x has only 64 MiB physical).
    out_itemsize = jnp.dtype(out_dtype).itemsize
    need = (2 * tile_n * Din * 2        # bf16 patch tiles
            + 2 * Din * L * 2           # bf16 weight (resident)
            + 2 * tile_n * L * 4        # f32 pos tile
            + 2 * tile_n * L * out_itemsize)
    vmem_limit_bytes = int(max(32 * 1024 * 1024,
                               min(2 * need, 64 * 1024 * 1024)))
    # TODO(synk): on v7x with very large Din*L, add pipeline_mode=pl.Buffered(1)
    # on the W^T spec and/or a K-tiled grid axis with a VMEM f32 accumulator.

    cost = pl.CostEstimate(
        flops=2 * B * N * Din * L,
        transcendentals=0,
        bytes_accessed=(B * N * Din * 2 + Din * L * 2 + N * L * 4
                        + B * N * L * out_itemsize),
    )

    # NOTE: real ViT L (768/1024) is lane-dense; the toy L=32 equals the full
    # array dim so the BlockSpec stays legal (stores are masked but tiny).
    patch_out = pl.pallas_call(
        _proj_kernel,
        out_shape=jax.ShapeDtypeStruct((B, N, L), out_dtype),
        grid=grid,
        in_specs=[
            pl.BlockSpec((1, tile_n, Din), lambda n, b: (b, n, 0)),  # patches
            pl.BlockSpec((Din, L), lambda n, b: (0, 0)),             # W^T
            pl.BlockSpec((tile_n, L), lambda n, b: (n, 0)),          # pos+bias
        ],
        out_specs=pl.BlockSpec((1, tile_n, L), lambda n, b: (b, n, 0)),
        compiler_params=pltpu.CompilerParams(
            dimension_semantics=("parallel", "parallel"),
            vmem_limit_bytes=vmem_limit_bytes),
        cost_estimate=cost,
    )(patches, w_bf16, pos_rows)

    # Class-token row: no projection, just cls + pos[0]; trivial wrapper op.
    cls_out = (class_token.astype(jnp.float32)
               + pos[0][None, None, :]).astype(out_dtype)

    return jnp.concatenate([cls_out, patch_out], axis=1)


if __name__ == "__main__":
    # Small shapes consistent with the module:
    #   patch_size=4, H=W=patch_size**2=16  =>  N = (H/p)*(W/p) = 16
    B, C, H, W = 2, 4, 16, 16
    P = 4
    L = 32
    N = (H // P) * (W // P)
    Din = P * P * C

    key = jax.random.PRNGKey(0)
    kx, kw, kb, kc, kp = jax.random.split(key, 5)
    x = jax.random.normal(kx, (B, C, H, W), dtype=jnp.float32)
    # nn.Linear(input_size, latent_size): weight (L, Din), bias (L,). Store W^T.
    w_t = (jax.random.normal(kw, (L, Din), dtype=jnp.float32) * 0.02).T
    bias = jax.random.normal(kb, (L,), dtype=jnp.float32) * 0.02
    class_token = jax.random.normal(kc, (B, 1, L), dtype=jnp.float32)
    pos_embedding = jax.random.normal(kp, (1, N + 1, L), dtype=jnp.float32)

    out = input_embedding(x, w_t, bias, class_token, pos_embedding, P)
    out = jax.block_until_ready(out)

    # Reference (plain JAX, f32).  Tolerance loosened intentionally: matmul
    # inputs are bf16 (f32 accumulation) — a deliberate precision choice.
    patches = x.reshape(B, C, H // P, P, W // P, P).transpose(0, 2, 4, 3, 5, 1)
    patches = patches.reshape(B, N, Din)
    ref = jnp.concatenate([class_token, patches @ w_t + bias], axis=1) + pos_embedding
    assert out.shape == (B, N + 1, L)
    assert out.dtype == x.dtype
    assert jnp.allclose(out, ref, atol=2e-2, rtol=2e-2), float(
        jnp.max(jnp.abs(out - ref)))

    print("KERNEL_OK")
</pallas_src>

<mosaic_0001>
module attributes {stable_mosaic.version = 11 : i64} {
  func.func @_proj_kernel(%arg0: i32, %arg1: i32, %arg2: memref<1x16x64xbf16, #tpu.memory_space<vmem>>, %arg3: memref<64x32xbf16, #tpu.memory_space<vmem>>, %arg4: memref<16x32xf32, #tpu.memory_space<vmem>>, %arg5: memref<1x16x32xf32, #tpu.memory_space<vmem>>) attributes {dimension_semantics = [#tpu.dimension_semantics<parallel>, #tpu.dimension_semantics<parallel>], iteration_bounds = array<i64: 1, 2>, scalar_prefetch = 0 : i64, scratch_operands = 0 : i64, tpu.core_type = #tpu.core_type<tc>, window_params = [{transform_indices = @transform_0, window_bounds = array<i64: 1, 16, 64>}, {pipeline_mode = #tpu.pipeline_mode<synchronous>, transform_indices = @transform_1, window_bounds = array<i64: 64, 32>}, {transform_indices = @transform_2, window_bounds = array<i64: 16, 32>}, {transform_indices = @transform_3, window_bounds = array<i64: 1, 16, 32>}]} {
    %c0 = arith.constant 0 : index
    %c0_0 = arith.constant 0 : index
    %c0_1 = arith.constant 0 : index
    %0 = vector.load %arg2[%c0, %c0_0, %c0_1] : memref<1x16x64xbf16, #tpu.memory_space<vmem>>, vector<1x16x64xbf16>
    %1 = vector.shape_cast %0 : vector<1x16x64xbf16> to vector<16x64xbf16>
    %c0_2 = arith.constant 0 : index
    %c0_3 = arith.constant 0 : index
    %2 = vector.load %arg3[%c0_2, %c0_3] : memref<64x32xbf16, #tpu.memory_space<vmem>>, vector<64x32xbf16>
    %cst = arith.constant dense<0.000000e+00> : vector<16x32xf32>
    %3 = tpu.matmul %1, %2, %cst {dimension_numbers = #tpu.dot_dimension_numbers<[1], [0], [0], [1], [0, 0, 1, 1], [], []>} : vector<16x64xbf16>, vector<64x32xbf16>, vector<16x32xf32> -> vector<16x32xf32>
    %c0_4 = arith.constant 0 : index
    %c0_5 = arith.constant 0 : index
    %4 = vector.load %arg4[%c0_4, %c0_5] : memref<16x32xf32, #tpu.memory_space<vmem>>, vector<16x32xf32>
    %5 = arith.addf %3, %4 : vector<16x32xf32>
    %c0_6 = arith.constant 0 : index
    %c0_7 = arith.constant 0 : index
    %c0_8 = arith.constant 0 : index
    %6 = vector.load %arg5[%c0_6, %c0_7, %c0_8] : memref<1x16x32xf32, #tpu.memory_space<vmem>>, vector<1x16x32xf32>
    %7 = vector.shape_cast %6 : vector<1x16x32xf32> to vector<16x32xf32>
    %8 = vector.shape_cast %5 : vector<16x32xf32> to vector<1x16x32xf32>
    tpu.vector_store %arg5[%c0_6, %c0_7, %c0_8], %8 {strides = array<i32>} : memref<1x16x32xf32, #tpu.memory_space<vmem>>, vector<1x16x32xf32>,
    return
  }
  func.func @transform_0(%arg0: i32, %arg1: i32) -> (i32, i32, i32) {
    %c0_i32 = arith.constant 0 : i32
    %c0_i32_0 = arith.constant 0 : i32
    return %arg1, %arg0, %c0_i32 : i32, i32, i32
  }
  func.func @transform_1(%arg0: i32, %arg1: i32) -> (i32, i32) {
    %c0_i32 = arith.constant 0 : i32
    %c0_i32_0 = arith.constant 0 : i32
    %c0_i32_1 = arith.constant 0 : i32
    return %c0_i32, %c0_i32_0 : i32, i32
  }
  func.func @transform_2(%arg0: i32, %arg1: i32) -> (i32, i32) {
    %c0_i32 = arith.constant 0 : i32
    %c0_i32_0 = arith.constant 0 : i32
    return %arg0, %c0_i32 : i32, i32
  }
  func.func @transform_3(%arg0: i32, %arg1: i32) -> (i32, i32, i32) {
    %c0_i32 = arith.constant 0 : i32
    %c0_i32_0 = arith.constant 0 : i32
    return %arg1, %arg0, %c0_i32 : i32, i32, i32
  }
}

</mosaic_0001>

<bundles_post_ra>
// kernel: tpu_custom_call.1
= control target key start
LH: loop header
LB: loop body
LE: loop exit
PB: predicated region body
PF: predicated region fallthrough
CT: control target
= control target key end

     0   :  { %8 = vsyncpa [#allocation3], 0  ;;  %s763_s0 = inlined_call_operand.vmem [shape: bf16[2,16,64], index: 0, kind: input, shape index: {}]   ;;  %s764_s1 = inlined_call_operand.vmem [shape: bf16[64,32], index: 1, kind: input, shape index: {}]   ;;  %s765_s2 = inlined_call_operand.vmem [shape: f32[16,32], index: 2, kind: input, shape index: {}]   ;;  %s766_s3 = inlined_call_operand.hbm [shape: f32[2,16,32], index: 3, kind: output, shape index: {}]  }
   0x1   :  { %10 = vsyncpa [#allocation3 + $0x1], 0  ;;  %s630_s12 = smov 0   ;;  %s632_s13 = smov 0  }
   0x2   :  { %s634_s14 = smov 0   ;;  %s636_s15 = smov 0  }
   0x3   :  { %s638_s16 = smov 0   ;;  %s640_s17 = smov 0  }
   0x4 LB: > { %s422_s18 = sadd.s32 4294967295, %s603_s17   ;;  %s423_s19 = sadd.s32 4294967294, %s603_s17   ;;  %s603_s17 = sphi %s640_s17, %s16_s17   ;;  %s599_s16 = sphi %s638_s16, %s773_s16   ;;  %s595_s15 = sphi %s636_s15, %s772_s15   ;;  %s591_s14 = sphi %s634_s14, %s771_s14   ;;  %s587_s13 = sphi %s632_s13, %s770_s13   ;;  %s583_s12 = sphi %s630_s12, %s769_s12  }
   0x5   : > { %s25_s20 = sadd.s32 1, %s599_s16  ;;  %s112_s21 = sadd.s32 1, %s591_s14 }
   0x6   : > { %p26_p0 = scmp.ge.s32.totalorder %s25_s20, 2  ;;  %p122_p1 = scmp.ne.s32.totalorder %s591_s14, %s587_s13 }
   0x7   : > { %p123_p2 = scmp.eq.s32.totalorder %s422_s18, 1  ;;  %p128_p3 = scmp.ne.s32.totalorder %s587_s13, %s583_s12 }
   0x8   : > { %s775_s20 = smov (%p26_p0, %s25_s20), 0  ;;  %p129_p5 = scmp.eq.s32.totalorder %s423_s19, 1 }
   0x9   : > { %p670_p4 = por %p123_p2, %p122_p1  ;;  %s107_s23 = ssub.s32 %s599_s16, %s775_s20 }
   0xa   : > { %p427_p6 = scmp.ge.s32.totalorder %s603_s17, 1  ;;  %p110_p7 = scmp.eq.s32.totalorder %s107_s23, 0 }
   0xb   : > { %p677_p8 = por %p129_p5, %p128_p3  ;;  %p172_p9 = scmp.lt.s32.totalorder %s603_s17, 3 }
   0xc   : > { %s683_s25 = scalar_select %p110_p7, %s591_s14, %s112_s21  }
   0xd   : > { %p173_p10 = pnand %p427_p6, %p172_p9 }
   0xe   : > { %v520_v0 = vld [vmem:[%s764_s1] sm:$0xff] (!%p173_p10)   ;;  %v605_v1 = vmov (!%p173_p10), 0.0   ;;  %v521_v2 = vld [vmem:[%s764_s1 + $0x8] sm:$0xff] (!%p173_p10)   ;;  %vm606_vm0 = vmmov (!%p173_p10), 0   ;;  %p206_p11 = scmp.lt.s32.totalorder (!%p173_p10), %s595_s15, 1  ;;  %v522_v3 = vld [vmem:[%s764_s1 + $0x10] sm:$0xff] (!%p173_p10)  }
   0xf   : > { %176 = sbr.rel (%p173_p10) target bundleno = 262 (0x106), region = 32  ;;  %449 = vmatprep.subr.bf16.mxu0 (!%p173_p10), %v605_v1  ;;  %457 = vmatprep.mubr.msk.bf16.mxu0 (!%p173_p10), %vm606_vm0, %v605_v1  ;;  %v523_v4 = vld [vmem:[%s764_s1 + $0x18] sm:$0xff] (!%p173_p10)   ;;  %vm264_vm1 = vcmask (!%p173_p10), 523264   ;;  %s202_s18 = sand.u32 (!%p173_p10), 1, %s587_s13   ;;  %v233_v6 = vld [vmem:[%s765_s2] sm:$0xff] (!%p173_p10)  ;;  %vm309_vm2 = vcmask (!%p173_p10), 261120  }
  0x10   : > { %450 = vmatpush3.bf16.msra.mxu0 (!%p173_p10), %v520_v0  ;;  %s428_s19 = sshll.u32 (!%p173_p10), %s202_s18, 4  ;;  %s443_s28 = sshll.u32 (!%p173_p10), %s595_s15, 8  ;;  %v234_v8 = vld [vmem:[%s765_s2 + $0x8] sm:$0xff] (!%p173_p10) }
  0x11   : > { %451 = vmatprep.subr.bf16.mxu0 (!%p173_p10), %v605_v1  ;;  %s204_s26 = scalar_lea.vmem (!%p173_p10), [#allocation2], %s428_s19  ;;  %s607_s8 = smov (!%p173_p10), [#allocation2]  }
  0x12   : > { %s328_s27 = sshll.u32 (!%p173_p10), %s204_s26, 4  ;;  %s710_s27 = int_to_ptr.vmem [resolvable:$true] %s328_s27 }
  0x13   : > { %s525_s7 = scalar_lea.vmem (!%p173_p10), %s710_s27, 256 }
  0x14   : > { %452 = vmatpush3.bf16.msra.mxu0 (!%p173_p10), %v521_v2  ;;  %p526_p12 = scmp.ne.s32.totalorder (!%p173_p10), %s710_s27, %s525_s7 }
  0x15   : > { %453 = vmatprep.subr.bf16.mxu0 (!%p173_p10), %v605_v1 }
  0x16   : > { %s207_s30 = scalar_select %p206_p11, %s595_s15, 1 }
  0x17   : > { %s717_s15 = scalar_lea.sflag [#allocation3], %s202_s18  ;;  %p527_p13 = pnand %p526_p12, %p670_p4 }
  0x18   : > { %s442_s6 = sshll.u32 %s207_s30, 3  ;;  %454 = vmatpush3.bf16.msra.mxu0 %v522_v3 }
  0x19   : > { %s213_s9 = scalar_lea.vmem %s763_s0, %s442_s6  ;;  %455 = vmatprep.subr.bf16.mxu0 %v605_v1  ;;  %s715_s6 = scalar_lea.hbm %s766_s3, %s443_s28 }
  0x1a   : > { %v524_v5 = vld [vmem:[%s213_s9] sm:$0xff]   ;;  %p528_p0 = pneg %p527_p13  ;;  %s529_s9 = sshll.u32 %s607_s8, 4  ;;  %s530_s9 = int_to_ptr.vmem [resolvable:$false] %s529_s9 }
  0x1b   : > { %s531_s10 = scalar_lea.vmem %s530_s9, 512  ;;  %p532_p1 = scmp.lt.s32.totalorder %s710_s27, %s530_s9 }
  0x1c   : > { %456 = vmatpush3.bf16.msra.mxu0 %v523_v4  ;;  %p533_p2 = scmp.lt.s32.totalorder %s531_s10, %s525_s7 }
  0x1e   : > { %p534_p3 = por %p533_p2, %p532_p1 }
  0x1f   : > { %458 = vmatmul.mubr.msk.bf16.vlgmr.msra.gmra.mrb[0].mxu0 %vm264_vm1, %v524_v5 }
  0x20   : > { %p535_p5 = pnand %p534_p3, %p528_p0 }
  0xf2   : > { %v302_v7 = vpop.f32.mrb[0].mxu0 }
  0xf3   : > { %v303_v9 = vadd.f32 %v302_v7, %v233_v6  ;;  %v459_v10 = vpop.f32.mrb[1].mxu0 }
  0xf4   : > { %v305_v11 = vpop.f32.mrb[2].mxu0 }
  0xf5   : > { %310 = vst.msk [vmem:[%s204_s26] sm:$0xff] %vm309_vm2, %v303_v9  ;;  %v306_v12 = vadd.f32 %v305_v11, %v234_v8  ;;  %v460_v13 = vpop.f32.mrb[3].mxu0 }
  0xf7   : > { %311 = vst.msk [vmem:[%s204_s26 + $0x8] sm:$0xff] %vm309_vm2, %v306_v12 }
  0xf8   : > { %538 = shalt.err (!%p535_p5)
}
  0xf9   : > { %s539_s11 = scalar_lea.hbm %s715_s6, 256  ;;  %s543_s21 = scalar_lea.hbm %s766_s3, 512 }
  0xfa   : > { %p540_p6 = scmp.ne.s32.totalorder %s715_s6, %s539_s11  ;;  %p544_p10 = scmp.lt.u32.totalorder %s715_s6, %s766_s3 }
  0xfb   : > { %p545_p11 = scmp.lt.u32.totalorder %s543_s21, %s539_s11  ;;  %p547_p13 = scmp.lt.u32.totalorder %s539_s11, %s715_s6 }
  0xfc   : > { %p541_p7 = pnand %p540_p6, %p670_p4 }
  0xfd   : > { %p546_p12 = por %p545_p11, %p544_p10 }
  0xfe   : > { %p542_p9 = pneg %p541_p7 }
  0xff   : > { %p548_p0 = por %p547_p13, %p546_p12 }
 0x101   : > { %p549_p1 = pnand %p548_p0, %p542_p9 }
 0x103   : > { %552 = shalt.err (!%p549_p1)
}
 0x104   : > { %s608_s28 = smov 128   ;;  %s609_s29 = smov 8  }
 0x105   : > { %461 = dma.vmem_to_hbm [thread:$0]  (%p670_p4), %s710_s27, 256, %s715_s6, %s717_s15, %s608_s28, %s608_s28, %s609_s29  }
 0x106 PF: > { %p467_p2 = scmp.ge.s32.totalorder %s603_s17, 2  ;;  %s343_s30 = sand.u32 1, %s583_s12  }
 0x107   : > { %s344_s4 = scalar_lea.sflag [#allocation3], %s343_s30 }
 0x108   : > { %p464_p3 = pnand %p467_p2, %p677_p8 }
 0x10a   : > { %578 = dma.done.wait (!%p464_p3), %s344_s4, 256  }
 0x10b   : > { %580 = vsyncadd (!%p464_p3), %s344_s4, 4294967040  ;;  %s16_s17 = sadd.s32 1, %s603_s17   ;;  %s769_s12 = smov %s587_s13 }
 0x10c   : > { %p13_p5 = scmp.ge.s32.totalorder %s16_s17, 4   ;;  %s770_s13 = smov %s591_s14 }
 0x10d   : > { %s771_s14 = smov %s683_s25  ;;  %s772_s15 = smov %s599_s16 }
 0x10e   : > { %s773_s16 = smov %s775_s20  ;;  %15 = sbr.rel (!%p13_p5) target bundleno = 4 (0x4), region = 70 }
 0x115   :  { %349 = vsyncpa [#allocation3], 1 }
 0x116   :  { %351 = vsyncpa [#allocation3 + $0x1], 1 }

</bundles_post_ra>
